<compile_context>
chip_gen: v7x
topology: tpu7x:2x2x1
jax: 0.10.0
libtpu: 0.0.40
codegen_flags: <defaults>
</compile_context>

<pallas_src>
import functools
import math

import jax
import jax.numpy as jnp
from jax.experimental import pallas as pl
from jax.experimental.pallas import tpu as pltpu


# ------------------------------ fused kernel --------------------------------

def _fused_kernel(*refs, n_bd, return_logvar):
    """Single-invocation fused forward for the whole ensemble.

    refs = [x, w0, b0, (wh, bh if n_bd>0), w_mean, w_lv, b_mean, b_lv,
            max_logvar, min_logvar, out]
    All weights are ensemble-packed (concatenated / block-diagonal) so each
    layer is one wide matmul covering every ensemble member.
    """
    it = iter(refs)
    x_ref = next(it)            # (N, K0) or (N, E*K0)
    w0_ref = next(it)           # (K0, E*H) or (E*K0, E*H)
    b0_ref = next(it)           # (1, E*H)
    if n_bd > 0:
        wh_ref = next(it)       # (n_bd, E*H, E*H) block-diagonal
        bh_ref = next(it)       # (n_bd, 1, E*H)
    wm_ref = next(it)           # (E*H, E*D) block-diagonal
    wv_ref = next(it)           # (E*H, E*D) block-diagonal
    bm_ref = next(it)           # (1, E*D)
    bv_ref = next(it)           # (1, E*D)
    maxlv_ref = next(it)        # (1, E*D)
    minlv_ref = next(it)        # (1, E*D)
    out_ref = next(it)          # (2, N, E*D)

    # Layer 0 (+ Swish) — one matmul for all ensemble members.
    h = jnp.dot(x_ref[...], w0_ref[...],
                preferred_element_type=jnp.float32) + b0_ref[...]
    h = h * jax.nn.sigmoid(h)

    # Hidden block-diagonal layers (+ Swish), statically unrolled.
    for i in range(n_bd):
        h = jnp.dot(h, wh_ref[i],
                    preferred_element_type=jnp.float32) + bh_ref[i]
        h = h * jax.nn.sigmoid(h)

    # Last layer split into mean / logvar heads (no activation).
    mean = jnp.dot(h, wm_ref[...],
                   preferred_element_type=jnp.float32) + bm_ref[...]
    raw_lv = jnp.dot(h, wv_ref[...],
                     preferred_element_type=jnp.float32) + bv_ref[...]

    maxlv = maxlv_ref[...]
    minlv = minlv_ref[...]
    lv = maxlv - jax.nn.softplus(maxlv - raw_lv)
    lv = minlv + jax.nn.softplus(lv - minlv)
    second = lv if return_logvar else jnp.exp(lv)

    # Merged output: mean in slab 0, var/logvar in slab 1 (one output operand).
    out_ref[0] = mean.astype(out_ref.dtype)
    out_ref[1] = second.astype(out_ref.dtype)


# ------------------------------ packing (host-side, once) -------------------

def _block_diag(blocks):
    """Block-diagonal matrix from a list of equally-shaped 2-D blocks."""
    e = len(blocks)
    r, c = blocks[0].shape
    out = jnp.zeros((e * r, e * c), blocks[0].dtype)
    for k, blk in enumerate(blocks):
        out = out.at[k * r:(k + 1) * r, k * c:(k + 1) * c].set(blk)
    return out


def pack_params(params, max_logvar, min_logvar, output_dim):
    """Pack per-member (E, in, out) params into ensemble-wide lane-packed mats."""
    E, K0, H = params[0][0].shape
    D = output_dim

    w0, b0 = params[0]                                         # (E,K0,H),(E,1,H)
    w0_cat = jnp.concatenate([w0[e] for e in range(E)], axis=-1)   # (K0, E*H)
    w0_bd = _block_diag([w0[e] for e in range(E)])                 # (E*K0, E*H)
    b0_row = b0.reshape(1, E * H)                                  # (1, E*H)

    hidden = params[1:-1]
    if hidden:
        wh = jnp.stack([_block_diag([w[e] for e in range(E)])
                        for (w, _) in hidden])                     # (n_bd,E*H,E*H)
        bh = jnp.stack([b.reshape(1, E * H) for (_, b) in hidden]) # (n_bd,1,E*H)
    else:
        wh, bh = None, None

    wl, bl = params[-1]                                        # (E,H,2D),(E,1,2D)
    w_mean = _block_diag([wl[e, :, :D] for e in range(E)])         # (E*H, E*D)
    w_lv = _block_diag([wl[e, :, D:] for e in range(E)])           # (E*H, E*D)
    b_mean = bl[:, :, :D].reshape(1, E * D)                        # (1, E*D)
    b_lv = bl[:, :, D:].reshape(1, E * D)                          # (1, E*D)

    maxlv_t = jnp.tile(max_logvar, (1, E))                         # (1, E*D)
    minlv_t = jnp.tile(min_logvar, (1, E))

    return dict(E=E, D=D, H=H, K0=K0,
                w0_cat=w0_cat, w0_bd=w0_bd, b0=b0_row,
                wh=wh, bh=bh,
                w_mean=w_mean, w_lv=w_lv, b_mean=b_mean, b_lv=b_lv,
                maxlv=maxlv_t, minlv=minlv_t)


# ------------------------------ forward wrapper ------------------------------

def model_forward(x, packed, return_logvar=False):
    """Fused single-call forward. Returns (mean, var) or (mean, logvar)."""
    E, D, K0 = packed['E'], packed['D'], packed['K0']
    n_bd = 0 if packed['wh'] is None else packed['wh'].shape[0]

    if x.ndim == 2:
        N = x.shape[0]
        x_in = x                                   # shared input -> concat W0
        w0 = packed['w0_cat']
    else:
        assert x.shape[0] == E
        N = x.shape[1]
        # per-member inputs -> pack into lanes (member-major), block-diag W0
        x_in = jnp.transpose(x, (1, 0, 2)).reshape(N, E * K0)
        w0 = packed['w0_bd']

    operands = [x_in, w0, packed['b0']]
    if n_bd > 0:
        operands += [packed['wh'], packed['bh']]
    operands += [packed['w_mean'], packed['w_lv'], packed['b_mean'],
                 packed['b_lv'], packed['maxlv'], packed['minlv']]

    out = pl.pallas_call(
        functools.partial(_fused_kernel, n_bd=n_bd, return_logvar=return_logvar),
        out_shape=jax.ShapeDtypeStruct((2, N, E * D), jnp.float32),
        in_specs=[pl.BlockSpec(memory_space=pltpu.MemorySpace.VMEM)
                  for _ in operands],
        out_specs=pl.BlockSpec(memory_space=pltpu.MemorySpace.VMEM),
    )(*operands)

    # Unpack lanes: (N, E*D) member-major -> (E, N, D).
    mean = out[0].reshape(N, E, D).transpose(1, 0, 2)
    second = out[1].reshape(N, E, D).transpose(1, 0, 2)
    return mean, second


# ------------------------------ parameter init -------------------------------

def init_params(key, obs_dim, act_dim, ensemble_size, hidden_layers,
                hidden_size, output_dim):
    dims = [obs_dim + act_dim] + [hidden_size] * hidden_layers + [2 * output_dim]
    params = []
    for i in range(len(dims) - 1):
        key, sub = jax.random.split(key)
        in_d, out_d = dims[i], dims[i + 1]
        # matches: weight.data.normal_(0.0, 1 / (2 * sqrt(input_dim))), bias = 0
        w = jax.random.normal(sub, (ensemble_size, in_d, out_d),
                              jnp.float32) * (1.0 / (2.0 * math.sqrt(in_d)))
        b = jnp.zeros((ensemble_size, 1, out_d), jnp.float32)
        params.append((w, b))
    max_logvar = jnp.ones((1, output_dim), jnp.float32) / 2.0
    min_logvar = -jnp.ones((1, output_dim), jnp.float32) * 10.0
    return params, max_logvar, min_logvar


# ------------------------------ pure-JAX reference ---------------------------

def reference_forward(x, params, max_logvar, min_logvar, output_dim):
    h = x
    n_layers = len(params)
    for i, (w, b) in enumerate(params):
        if h.ndim == 2:
            h = jnp.einsum('ij,bjk->bik', h, w)
        else:
            h = jnp.einsum('bij,bjk->bik', h, w)
        h = h + b
        if i < n_layers - 1:
            h = h * jax.nn.sigmoid(h)
    mean = h[:, :, :output_dim]
    lv = max_logvar - jax.nn.softplus(max_logvar - h[:, :, output_dim:])
    lv = min_logvar + jax.nn.softplus(lv - min_logvar)
    return mean, jnp.exp(lv)


if __name__ == "__main__":
    obs_dim, act_dim = 8, 4
    ensemble_size, hidden_layers, hidden_size = 7, 4, 32
    rew_dim, with_reward = 1, False
    output_dim = obs_dim + rew_dim if with_reward else obs_dim
    N = 8  # batch

    key = jax.random.PRNGKey(0)
    pkey, xkey = jax.random.split(key)
    params, max_logvar, min_logvar = init_params(
        pkey, obs_dim, act_dim, ensemble_size, hidden_layers, hidden_size,
        output_dim)
    packed = pack_params(params, max_logvar, min_logvar, output_dim)

    # ---- shared 2-D input path (mean, var) ----
    x = jax.random.normal(xkey, (N, obs_dim + act_dim), jnp.float32)
    mean, var = model_forward(x, packed)
    mean, var = jax.block_until_ready((mean, var))

    ref_mean, ref_var = reference_forward(x, params, max_logvar, min_logvar,
                                          output_dim)
    assert mean.shape == (ensemble_size, N, output_dim)
    assert var.shape == (ensemble_size, N, output_dim)
    assert jnp.allclose(mean, ref_mean, atol=1e-4, rtol=1e-4)
    assert jnp.allclose(var, ref_var, atol=1e-4, rtol=1e-4)

    # ---- per-member 3-D input path + return_logvar ----
    x3 = jax.random.normal(jax.random.PRNGKey(1),
                           (ensemble_size, N, obs_dim + act_dim), jnp.float32)
    m3, lv3 = model_forward(x3, packed, return_logvar=True)
    m3, lv3 = jax.block_until_ready((m3, lv3))
    rm3, rv3 = reference_forward(x3, params, max_logvar, min_logvar, output_dim)
    assert jnp.allclose(m3, rm3, atol=1e-4, rtol=1e-4)
    assert jnp.allclose(jnp.exp(lv3), rv3, atol=1e-4, rtol=1e-4)

    print("KERNEL_OK")
</pallas_src>

<mosaic_0001>
module attributes {stable_mosaic.version = 11 : i64} {
  func.func @_fused_kernel(%arg0: memref<8x12xf32, #tpu.memory_space<vmem>>, %arg1: memref<12x224xf32, #tpu.memory_space<vmem>>, %arg2: memref<1x224xf32, #tpu.memory_space<vmem>>, %arg3: memref<3x224x224xf32, #tpu.memory_space<vmem>>, %arg4: memref<3x1x224xf32, #tpu.memory_space<vmem>>, %arg5: memref<224x56xf32, #tpu.memory_space<vmem>>, %arg6: memref<224x56xf32, #tpu.memory_space<vmem>>, %arg7: memref<1x56xf32, #tpu.memory_space<vmem>>, %arg8: memref<1x56xf32, #tpu.memory_space<vmem>>, %arg9: memref<1x56xf32, #tpu.memory_space<vmem>>, %arg10: memref<1x56xf32, #tpu.memory_space<vmem>>, %arg11: memref<2x8x56xf32, #tpu.memory_space<vmem>>) attributes {dimension_semantics = [], scalar_prefetch = 0 : i64, scratch_operands = 0 : i64, tpu.core_type = #tpu.core_type<tc>} {
    %c0 = arith.constant 0 : index
    %c0_0 = arith.constant 0 : index
    %0 = vector.load %arg0[%c0, %c0_0] : memref<8x12xf32, #tpu.memory_space<vmem>>, vector<8x12xf32>
    %c0_1 = arith.constant 0 : index
    %c0_2 = arith.constant 0 : index
    %1 = vector.load %arg1[%c0_1, %c0_2] : memref<12x224xf32, #tpu.memory_space<vmem>>, vector<12x224xf32>
    %cst = arith.constant dense<0.000000e+00> : vector<8x224xf32>
    %2 = tpu.matmul %0, %1, %cst {dimension_numbers = #tpu.dot_dimension_numbers<[1], [0], [0], [1], [0, 0, 1, 1], [], []>} : vector<8x12xf32>, vector<12x224xf32>, vector<8x224xf32> -> vector<8x224xf32>
    %c0_3 = arith.constant 0 : index
    %c0_4 = arith.constant 0 : index
    %3 = vector.load %arg2[%c0_3, %c0_4] : memref<1x224xf32, #tpu.memory_space<vmem>>, vector<1x224xf32>
    %4 = vector.broadcast %3 : vector<1x224xf32> to vector<8x224xf32>
    %5 = arith.addf %2, %4 : vector<8x224xf32>
    %6 = arith.negf %5 : vector<8x224xf32>
    %7 = math.exp %6 : vector<8x224xf32>
    %cst_5 = arith.constant 1.000000e+00 : f32
    %8 = vector.broadcast %cst_5 : f32 to vector<8x224xf32>
    %9 = arith.addf %8, %7 : vector<8x224xf32>
    %10 = arith.divf %8, %9 : vector<8x224xf32>
    %11 = arith.mulf %5, %10 : vector<8x224xf32>
    %c0_6 = arith.constant 0 : index
    %c0_7 = arith.constant 0 : index
    %c0_8 = arith.constant 0 : index
    %12 = vector.load %arg3[%c0_6, %c0_7, %c0_8] : memref<3x224x224xf32, #tpu.memory_space<vmem>>, vector<1x224x224xf32>
    %13 = vector.shape_cast %12 : vector<1x224x224xf32> to vector<224x224xf32>
    %cst_9 = arith.constant dense<0.000000e+00> : vector<8x224xf32>
    %14 = tpu.matmul %11, %13, %cst_9 {dimension_numbers = #tpu.dot_dimension_numbers<[1], [0], [0], [1], [0, 0, 1, 1], [], []>} : vector<8x224xf32>, vector<224x224xf32>, vector<8x224xf32> -> vector<8x224xf32>
    %c0_10 = arith.constant 0 : index
    %c0_11 = arith.constant 0 : index
    %c0_12 = arith.constant 0 : index
    %15 = vector.load %arg4[%c0_10, %c0_11, %c0_12] : memref<3x1x224xf32, #tpu.memory_space<vmem>>, vector<1x1x224xf32>
    %16 = vector.shape_cast %15 : vector<1x1x224xf32> to vector<1x224xf32>
    %17 = vector.broadcast %16 : vector<1x224xf32> to vector<8x224xf32>
    %18 = arith.addf %14, %17 : vector<8x224xf32>
    %19 = arith.negf %18 : vector<8x224xf32>
    %20 = math.exp %19 : vector<8x224xf32>
    %cst_13 = arith.constant 1.000000e+00 : f32
    %21 = vector.broadcast %cst_13 : f32 to vector<8x224xf32>
    %22 = arith.addf %21, %20 : vector<8x224xf32>
    %23 = arith.divf %21, %22 : vector<8x224xf32>
    %24 = arith.mulf %18, %23 : vector<8x224xf32>
    %c1 = arith.constant 1 : index
    %c0_14 = arith.constant 0 : index
    %c0_15 = arith.constant 0 : index
    %25 = vector.load %arg3[%c1, %c0_14, %c0_15] : memref<3x224x224xf32, #tpu.memory_space<vmem>>, vector<1x224x224xf32>
    %26 = vector.shape_cast %25 : vector<1x224x224xf32> to vector<224x224xf32>
    %cst_16 = arith.constant dense<0.000000e+00> : vector<8x224xf32>
    %27 = tpu.matmul %24, %26, %cst_16 {dimension_numbers = #tpu.dot_dimension_numbers<[1], [0], [0], [1], [0, 0, 1, 1], [], []>} : vector<8x224xf32>, vector<224x224xf32>, vector<8x224xf32> -> vector<8x224xf32>
    %c1_17 = arith.constant 1 : index
    %c0_18 = arith.constant 0 : index
    %c0_19 = arith.constant 0 : index
    %28 = vector.load %arg4[%c1_17, %c0_18, %c0_19] : memref<3x1x224xf32, #tpu.memory_space<vmem>>, vector<1x1x224xf32>
    %29 = vector.shape_cast %28 : vector<1x1x224xf32> to vector<1x224xf32>
    %30 = vector.broadcast %29 : vector<1x224xf32> to vector<8x224xf32>
    %31 = arith.addf %27, %30 : vector<8x224xf32>
    %32 = arith.negf %31 : vector<8x224xf32>
    %33 = math.exp %32 : vector<8x224xf32>
    %cst_20 = arith.constant 1.000000e+00 : f32
    %34 = vector.broadcast %cst_20 : f32 to vector<8x224xf32>
    %35 = arith.addf %34, %33 : vector<8x224xf32>
    %36 = arith.divf %34, %35 : vector<8x224xf32>
    %37 = arith.mulf %31, %36 : vector<8x224xf32>
    %c2 = arith.constant 2 : index
    %c0_21 = arith.constant 0 : index
    %c0_22 = arith.constant 0 : index
    %38 = vector.load %arg3[%c2, %c0_21, %c0_22] : memref<3x224x224xf32, #tpu.memory_space<vmem>>, vector<1x224x224xf32>
    %39 = vector.shape_cast %38 : vector<1x224x224xf32> to vector<224x224xf32>
    %cst_23 = arith.constant dense<0.000000e+00> : vector<8x224xf32>
    %40 = tpu.matmul %37, %39, %cst_23 {dimension_numbers = #tpu.dot_dimension_numbers<[1], [0], [0], [1], [0, 0, 1, 1], [], []>} : vector<8x224xf32>, vector<224x224xf32>, vector<8x224xf32> -> vector<8x224xf32>
    %c2_24 = arith.constant 2 : index
    %c0_25 = arith.constant 0 : index
    %c0_26 = arith.constant 0 : index
    %41 = vector.load %arg4[%c2_24, %c0_25, %c0_26] : memref<3x1x224xf32, #tpu.memory_space<vmem>>, vector<1x1x224xf32>
    %42 = vector.shape_cast %41 : vector<1x1x224xf32> to vector<1x224xf32>
    %43 = vector.broadcast %42 : vector<1x224xf32> to vector<8x224xf32>
    %44 = arith.addf %40, %43 : vector<8x224xf32>
    %45 = arith.negf %44 : vector<8x224xf32>
    %46 = math.exp %45 : vector<8x224xf32>
    %cst_27 = arith.constant 1.000000e+00 : f32
    %47 = vector.broadcast %cst_27 : f32 to vector<8x224xf32>
    %48 = arith.addf %47, %46 : vector<8x224xf32>
    %49 = arith.divf %47, %48 : vector<8x224xf32>
    %50 = arith.mulf %44, %49 : vector<8x224xf32>
    %c0_28 = arith.constant 0 : index
    %c0_29 = arith.constant 0 : index
    %51 = vector.load %arg5[%c0_28, %c0_29] : memref<224x56xf32, #tpu.memory_space<vmem>>, vector<224x56xf32>
    %cst_30 = arith.constant dense<0.000000e+00> : vector<8x56xf32>
    %52 = tpu.matmul %50, %51, %cst_30 {dimension_numbers = #tpu.dot_dimension_numbers<[1], [0], [0], [1], [0, 0, 1, 1], [], []>} : vector<8x224xf32>, vector<224x56xf32>, vector<8x56xf32> -> vector<8x56xf32>
    %c0_31 = arith.constant 0 : index
    %c0_32 = arith.constant 0 : index
    %53 = vector.load %arg7[%c0_31, %c0_32] : memref<1x56xf32, #tpu.memory_space<vmem>>, vector<1x56xf32>
    %54 = vector.broadcast %53 : vector<1x56xf32> to vector<8x56xf32>
    %55 = arith.addf %52, %54 : vector<8x56xf32>
    %c0_33 = arith.constant 0 : index
    %c0_34 = arith.constant 0 : index
    %56 = vector.load %arg6[%c0_33, %c0_34] : memref<224x56xf32, #tpu.memory_space<vmem>>, vector<224x56xf32>
    %cst_35 = arith.constant dense<0.000000e+00> : vector<8x56xf32>
    %57 = tpu.matmul %50, %56, %cst_35 {dimension_numbers = #tpu.dot_dimension_numbers<[1], [0], [0], [1], [0, 0, 1, 1], [], []>} : vector<8x224xf32>, vector<224x56xf32>, vector<8x56xf32> -> vector<8x56xf32>
    %c0_36 = arith.constant 0 : index
    %c0_37 = arith.constant 0 : index
    %58 = vector.load %arg8[%c0_36, %c0_37] : memref<1x56xf32, #tpu.memory_space<vmem>>, vector<1x56xf32>
    %59 = vector.broadcast %58 : vector<1x56xf32> to vector<8x56xf32>
    %60 = arith.addf %57, %59 : vector<8x56xf32>
    %c0_38 = arith.constant 0 : index
    %c0_39 = arith.constant 0 : index
    %61 = vector.load %arg9[%c0_38, %c0_39] : memref<1x56xf32, #tpu.memory_space<vmem>>, vector<1x56xf32>
    %c0_40 = arith.constant 0 : index
    %c0_41 = arith.constant 0 : index
    %62 = vector.load %arg10[%c0_40, %c0_41] : memref<1x56xf32, #tpu.memory_space<vmem>>, vector<1x56xf32>
    %63 = vector.broadcast %61 : vector<1x56xf32> to vector<8x56xf32>
    %64 = arith.subf %63, %60 : vector<8x56xf32>
    %cst_42 = arith.constant 0.000000e+00 : f32
    %65 = vector.broadcast %cst_42 : f32 to vector<8x56xf32>
    %66 = arith.maximumf %64, %65 : vector<8x56xf32>
    %67 = vector.broadcast %cst_42 : f32 to vector<8x56xf32>
    %68 = arith.subf %64, %67 : vector<8x56xf32>
    %69 = arith.cmpf one, %68, %68 : vector<8x56xf32>
    %70 = vector.broadcast %cst_42 : f32 to vector<8x56xf32>
    %71 = arith.addf %64, %70 : vector<8x56xf32>
    %72 = math.absf %68 : vector<8x56xf32>
    %cst_43 = arith.constant 0.000000e+00 : f32
    %73 = vector.broadcast %cst_43 : f32 to vector<8x56xf32>
    %74 = arith.subf %73, %72 : vector<8x56xf32>
    %75 = math.exp %74 : vector<8x56xf32>
    %76 = math.log1p %75 : vector<8x56xf32>
    %77 = arith.addf %66, %76 : vector<8x56xf32>
    %78 = arith.select %69, %71, %77 : vector<8x56xi1>, vector<8x56xf32>
    %79 = vector.broadcast %61 : vector<1x56xf32> to vector<8x56xf32>
    %80 = arith.subf %79, %78 : vector<8x56xf32>
    %81 = vector.broadcast %62 : vector<1x56xf32> to vector<8x56xf32>
    %82 = arith.subf %80, %81 : vector<8x56xf32>
    %cst_44 = arith.constant 0.000000e+00 : f32
    %83 = vector.broadcast %cst_44 : f32 to vector<8x56xf32>
    %84 = arith.maximumf %82, %83 : vector<8x56xf32>
    %85 = vector.broadcast %cst_44 : f32 to vector<8x56xf32>
    %86 = arith.subf %82, %85 : vector<8x56xf32>
    %87 = arith.cmpf one, %86, %86 : vector<8x56xf32>
    %88 = vector.broadcast %cst_44 : f32 to vector<8x56xf32>
    %89 = arith.addf %82, %88 : vector<8x56xf32>
    %90 = math.absf %86 : vector<8x56xf32>
    %cst_45 = arith.constant 0.000000e+00 : f32
    %91 = vector.broadcast %cst_45 : f32 to vector<8x56xf32>
    %92 = arith.subf %91, %90 : vector<8x56xf32>
    %93 = math.exp %92 : vector<8x56xf32>
    %94 = math.log1p %93 : vector<8x56xf32>
    %95 = arith.addf %84, %94 : vector<8x56xf32>
    %96 = arith.select %87, %89, %95 : vector<8x56xi1>, vector<8x56xf32>
    %97 = vector.broadcast %62 : vector<1x56xf32> to vector<8x56xf32>
    %98 = arith.addf %97, %96 : vector<8x56xf32>
    %99 = math.exp %98 : vector<8x56xf32>
    %c0_46 = arith.constant 0 : index
    %c0_47 = arith.constant 0 : index
    %c0_48 = arith.constant 0 : index
    %100 = vector.load %arg11[%c0_46, %c0_47, %c0_48] : memref<2x8x56xf32, #tpu.memory_space<vmem>>, vector<1x8x56xf32>
    %101 = vector.shape_cast %100 : vector<1x8x56xf32> to vector<8x56xf32>
    %102 = vector.shape_cast %55 : vector<8x56xf32> to vector<1x8x56xf32>
    tpu.vector_store %arg11[%c0_46, %c0_47, %c0_48], %102 {strides = array<i32>} : memref<2x8x56xf32, #tpu.memory_space<vmem>>, vector<1x8x56xf32>,
    %c1_49 = arith.constant 1 : index
    %c0_50 = arith.constant 0 : index
    %c0_51 = arith.constant 0 : index
    %103 = vector.load %arg11[%c1_49, %c0_50, %c0_51] : memref<2x8x56xf32, #tpu.memory_space<vmem>>, vector<1x8x56xf32>
    %104 = vector.shape_cast %103 : vector<1x8x56xf32> to vector<8x56xf32>
    %105 = vector.shape_cast %99 : vector<8x56xf32> to vector<1x8x56xf32>
    tpu.vector_store %arg11[%c1_49, %c0_50, %c0_51], %105 {strides = array<i32>} : memref<2x8x56xf32, #tpu.memory_space<vmem>>, vector<1x8x56xf32>,
    return
  }
}

</mosaic_0001>

<bundles_post_ra>
// kernel: tpu_custom_call.1
= control target key start
LH: loop header
LB: loop body
LE: loop exit
PB: predicated region body
PF: predicated region fallthrough
CT: control target
= control target key end

     0   :  { %16 = vsyncpa [#allocation3], 0  ;;  %s1663_s0 = inlined_call_operand.vmem [shape: f32[8,12], index: 0, kind: input, shape index: {}]   ;;  %s1664_s1 = inlined_call_operand.vmem [shape: f32[12,224], index: 1, kind: input, shape index: {}]   ;;  %s1665_s2 = inlined_call_operand.vmem [shape: f32[1,224], index: 2, kind: input, shape index: {}]   ;;  %s1666_s3 = inlined_call_operand.hbm [shape: f32[3,224,224], index: 3, kind: input, shape index: {}]   ;;  %s1667_s4 = inlined_call_operand.vmem [shape: f32[3,1,224], index: 4, kind: input, shape index: {}]   ;;  %s1668_s5 = inlined_call_operand.vmem [shape: f32[224,56], index: 5, kind: input, shape index: {}]   ;;  %s1669_s6 = inlined_call_operand.vmem [shape: f32[224,56], index: 6, kind: input, shape index: {}]   ;;  %s1670_s7 = inlined_call_operand.vmem [shape: f32[1,56], index: 7, kind: input, shape index: {}]   ;;  %s1671_s8 = inlined_call_operand.vmem [shape: f32[1,56], index: 8, kind: input, shape index: {}]   ;;  %s1672_s9 = inlined_call_operand.vmem [shape: f32[1,56], index: 9, kind: input, shape index: {}]   ;;  %s1673_s10 = inlined_call_operand.vmem [shape: f32[1,56], index: 10, kind: input, shape index: {}]   ;;  %s1674_s11 = inlined_call_operand.hbm [shape: f32[2,8,56], index: 11, kind: output, shape index: {}]  }
   0x1   :  { %17 = vsyncpa [#allocation4], 0  ;;  %s1308_s17 = smov [#allocation2]   ;;  %s1260_s21 = scalar_lea.hbm %s1666_s3, 21504 }
   0x2   :  { %s29_s18 = sshll.u32 %s1308_s17, 4  ;;  %p1261_p0 = scmp.ne.s32.totalorder %s1666_s3, %s1260_s21  ;;  %s30_s18 = int_to_ptr.vmem [resolvable:$true] %s29_s18 }
   0x3   :  { %p1264_p1 = scmp.lt.u32.totalorder %s1260_s21, %s1666_s3 }
   0x5   :  { %p1266_p2 = pnand %p1264_p1, %p1261_p0 }
   0x7   :  { %1269 = shalt.err (!%p1266_p2)
}
   0x8   :  { %s1270_s26 = scalar_lea.vmem %s30_s18, 21504  ;;  %p1275_p4 = scmp.lt.s32.totalorder %s30_s18, %s30_s18 }
   0x9   :  { %p1271_p3 = scmp.ne.s32.totalorder %s30_s18, %s1270_s26  ;;  %p1276_p5 = scmp.lt.s32.totalorder %s1270_s26, %s1270_s26 }
   0xb   :  { %p1277_p6 = por %p1276_p5, %p1275_p4 }
   0xd   :  { %p1278_p7 = pnand %p1277_p6, %p1271_p3 }
   0xf   :  { %1281 = shalt.err (!%p1278_p7)
}
  0x10   :  { %s1309_s27 = smov 256   ;;  %s1310_s28 = smov 16  }
  0x11   :  { %35 = dma.hbm_to_vmem [thread:$0]  %s1666_s3, 21504, %s30_s18, [#allocation3], %s1309_s27, %s1309_s27, %s1310_s28  }
  0x12   :  { %1304 = dma.done.wait [#allocation3], 21504  }
  0x13   :  { %1305 = vsyncadd [#allocation3], 4294945792  ;;  %v1311_v0 = vmov 0.0   ;;  %vm74_vm0 = vcmask 1043456   ;;  %vm1312_vm1 = vmmov 1   ;;  %v55_v2 = vld [vmem:[%s1664_s1 + $0x8] sm:$0xff] }
  0x14   :  { %145 = vmatprep.mubr.f32.mxu0 %v1311_v0  ;;  %vm1389_vm2 = vmpackc.low %vm74_vm0, %vm1312_vm1  ;;  %v57_v3 = vld [vmem:[%s1664_s1 + $0x18] sm:$0xf]  ;;  %v54_v4 = vld [vmem:[%s1664_s1] sm:$0xff]  ;;  %vm70_vm3 = vcmask 97280   ;;  %vm234_vm4 = vcmask 785408   ;;  %vm908_vm5 = vcmask 457728  }
  0x15   :  { %v951_v5 = vpack.c.bf16 %v57_v3, %v55_v2  ;;  %v56_v6 = vld [vmem:[%s1664_s1 + $0x10] sm:$0xf]  ;;  %v167_v7 = vld [vmem:[#allocation2 + $0x8] sm:$0xff]  ;;  %v53_v9 = vld [vmem:[%s1663_s0] sm:$0xff] }
  0x16   :  { %v954_v8 = vpack.c.bf16 %v56_v6, %v54_v4  ;;  %v169_v10 = vld [vmem:[#allocation2 + $0x18] sm:$0xff]  ;;  %v166_v11 = vld [vmem:[#allocation2] sm:$0xff]  ;;  %v168_v12 = vld [vmem:[#allocation2 + $0x10] sm:$0xff] }
  0x17   :  { %953 = vmatprep.subr.msk.bf16.mxu0 %vm1389_vm2, %v951_v5  ;;  %v957_v13 = vpack.c.bf16 %v169_v10, %v167_v7  ;;  %v959_v14 = vpack.c.bf16 %v168_v12, %v166_v11  ;;  %v171_v15 = vld [vmem:[#allocation2 + $0x28] sm:$0xff]  ;;  %v173_v16 = vld [vmem:[#allocation2 + $0x38] sm:$0xff]  ;;  %v170_v17 = vld [vmem:[#allocation2 + $0x20] sm:$0xff] }
  0x18   :  { %956 = vmatpush1.bf16.msk.msra.mxu0 %vm1389_vm2, %v954_v8  ;;  %v961_v18 = vpack.c.bf16 %v173_v16, %v171_v15  ;;  %v172_v19 = vld [vmem:[#allocation2 + $0x30] sm:$0xff]  ;;  %v175_v20 = vld [vmem:[#allocation2 + $0x48] sm:$0xff]  ;;  %v177_v21 = vld [vmem:[#allocation2 + $0x58] sm:$0xff] }
  0x19   :  { %958 = vmatprep.subr.bf16.mxu1 %v957_v13  ;;  %v963_v22 = vpack.c.bf16 %v172_v19, %v170_v17  ;;  %v965_v23 = vpack.c.bf16 %v177_v21, %v175_v20  ;;  %v174_v24 = vld [vmem:[#allocation2 + $0x40] sm:$0xff]  ;;  %v176_v25 = vld [vmem:[#allocation2 + $0x50] sm:$0xff]  ;;  %v179_v26 = vld [vmem:[#allocation2 + $0x68] sm:$0xff] }
  0x1a   :  { %960 = vmatpush1.bf16.msra.mxu1 %v959_v14  ;;  %v181_v27 = vld [vmem:[#allocation2 + $0x78] sm:$0xff]  ;;  %v967_v28 = vpack.c.bf16 %v176_v25, %v174_v24  ;;  %v178_v30 = vld [vmem:[#allocation2 + $0x60] sm:$0xff]  ;;  %v180_v31 = vld [vmem:[#allocation2 + $0x70] sm:$0xff] }
  0x1b   :  { %931 = vmatmul.mubr.msk.f32.vlgmr.msra.gmra.mrb[0].mxu0 %vm70_vm3, %v53_v9  ;;  %962 = vmatprep.subr.bf16.mxu1 %v961_v18  ;;  %v969_v29 = vpack.c.bf16 %v181_v27, %v179_v26  ;;  %v183_v32 = vld [vmem:[#allocation2 + $0x88] sm:$0xff]  ;;  %v185_v33 = vld [vmem:[#allocation2 + $0x98] sm:$0xff]  ;;  %v971_v34 = vpack.c.bf16 %v180_v31, %v178_v30  ;;  %v182_v36 = vld [vmem:[#allocation2 + $0x80] sm:$0xff] }
  0x1c   :  { %v973_v35 = vpack.c.bf16 %v185_v33, %v183_v32  ;;  %v184_v37 = vld [vmem:[#allocation2 + $0x90] sm:$0xff]  ;;  %v187_v38 = vld [vmem:[#allocation2 + $0xa8] sm:$0xff]  ;;  %v189_v39 = vld [vmem:[#allocation2 + $0xb8] sm:$0xff] }
  0x1d   :  { %v975_v40 = vpack.c.bf16 %v184_v37, %v182_v36  ;;  %v977_v41 = vpack.c.bf16 %v189_v39, %v187_v38  ;;  %v186_v42 = vld [vmem:[#allocation2 + $0xa0] sm:$0xff]  ;;  %v188_v43 = vld [vmem:[#allocation2 + $0xb0] sm:$0xff]  ;;  %v191_v45 = vld [vmem:[#allocation2 + $0xc8] sm:$0xff] }
  0x1e   :  { %964 = vmatpush1.bf16.msra.mxu1 %v963_v22  ;;  %v979_v44 = vpack.c.bf16 %v188_v43, %v186_v42  ;;  %v193_v46 = vld [vmem:[#allocation2 + $0xd8] sm:$0xff]  ;;  %v190_v48 = vld [vmem:[#allocation2 + $0xc0] sm:$0xff]  ;;  %v192_v49 = vld [vmem:[#allocation2 + $0xd0] sm:$0xff] }
  0x1f   :  { %966 = vmatprep.subr.bf16.mxu1 %v965_v23  ;;  %v981_v47 = vpack.c.bf16 %v193_v46, %v191_v45  ;;  %v983_v50 = vpack.c.bf16 %v192_v49, %v190_v48  ;;  %v195_v51 = vld [vmem:[#allocation2 + $0xe8] sm:$0xff]  ;;  %v197_v52 = vld [vmem:[#allocation2 + $0xf8] sm:$0xff]  ;;  %v194_v54 = vld [vmem:[#allocation2 + $0xe0] sm:$0xff] }
  0x20   :  { %v985_v53 = vpack.c.bf16 %v197_v52, %v195_v51  ;;  %v196_v55 = vld [vmem:[#allocation2 + $0xf0] sm:$0xff]  ;;  %v199_v57 = vld [vmem:[#allocation2 + $0x108] sm:$0xff]  ;;  %v201_v58 = vld [vmem:[#allocation2 + $0x118] sm:$0xff] }
  0x21   :  { %v987_v56 = vpack.c.bf16 %v196_v55, %v194_v54  ;;  %v989_v59 = vpack.c.bf16 %v201_v58, %v199_v57  ;;  %v198_v60 = vld [vmem:[#allocation2 + $0x100] sm:$0xff]  ;;  %v200_v61 = vld [vmem:[#allocation2 + $0x110] sm:$0xff]  ;;  %v203_v63 = vld [vmem:[#allocation2 + $0x128] sm:$0xff] }
  0x22   :  { %968 = vmatpush1.bf16.msra.mxu1 %v967_v28  ;;  %v991_v62 = vpack.c.bf16 %v200_v61, %v198_v60  ;;  %v205_v0 = vld [vmem:[#allocation2 + $0x138] sm:$0xff]  ;;  %v202_v2 = vld [vmem:[#allocation2 + $0x120] sm:$0xff]  ;;  %v204_v3 = vld [vmem:[#allocation2 + $0x130] sm:$0xff] }
  0x23   :  { %970 = vmatprep.subr.bf16.mxu1 %v969_v29  ;;  %v993_v1 = vpack.c.bf16 %v205_v0, %v203_v63  ;;  %v995_v4 = vpack.c.bf16 %v204_v3, %v202_v2  ;;  %v207_v5 = vld [vmem:[#allocation2 + $0x148] sm:$0xff]  ;;  %v209_v6 = vld [vmem:[#allocation2 + $0x158] sm:$0xff]  ;;  %v206_v8 = vld [vmem:[#allocation2 + $0x140] sm:$0xff] }
  0x24   :  { %v997_v7 = vpack.c.bf16 %v209_v6, %v207_v5  ;;  %v208_v9 = vld [vmem:[#allocation2 + $0x150] sm:$0xff]  ;;  %v211_v11 = vld [vmem:[#allocation2 + $0x168] sm:$0xff]  ;;  %v213_v12 = vld [vmem:[#allocation2 + $0x178] sm:$0xff] }
  0x25   :  { %v999_v10 = vpack.c.bf16 %v208_v9, %v206_v8  ;;  %v1001_v13 = vpack.c.bf16 %v213_v12, %v211_v11  ;;  %v210_v14 = vld [vmem:[#allocation2 + $0x160] sm:$0xff]  ;;  %v212_v15 = vld [vmem:[#allocation2 + $0x170] sm:$0xff]  ;;  %v215_v17 = vld [vmem:[#allocation2 + $0x188] sm:$0xff] }
  0x26   :  { %972 = vmatpush1.bf16.msra.mxu1 %v971_v34  ;;  %v1003_v16 = vpack.c.bf16 %v212_v15, %v210_v14  ;;  %v217_v18 = vld [vmem:[#allocation2 + $0x198] sm:$0xff]  ;;  %v214_v20 = vld [vmem:[#allocation2 + $0x180] sm:$0xff]  ;;  %v216_v21 = vld [vmem:[#allocation2 + $0x190] sm:$0xff] }
  0x27   :  { %974 = vmatprep.subr.bf16.mxu1 %v973_v35  ;;  %v1005_v19 = vpack.c.bf16 %v217_v18, %v215_v17  ;;  %v1007_v22 = vpack.c.bf16 %v216_v21, %v214_v20  ;;  %v219_v23 = vld [vmem:[#allocation2 + $0x1a8] sm:$0xff]  ;;  %v221_v24 = vld [vmem:[#allocation2 + $0x1b8] sm:$0xff]  ;;  %v218_v26 = vld [vmem:[#allocation2 + $0x1a0] sm:$0xff] }
  0x28   :  { %v1009_v25 = vpack.c.bf16 %v221_v24, %v219_v23  ;;  %v220_v27 = vld [vmem:[#allocation2 + $0x1b0] sm:$0xff]  ;;  %v325_v29 = vld [vmem:[#allocation2 + $0x1c8] sm:$0xff]  ;;  %v327_v30 = vld [vmem:[#allocation2 + $0x1d8] sm:$0xff] }
  0x29   :  { %v1011_v28 = vpack.c.bf16 %v220_v27, %v218_v26  ;;  %v324_v31 = vld [vmem:[#allocation2 + $0x1c0] sm:$0xff]  ;;  %v1013_v32 = vpack.c.bf16 %v327_v30, %v325_v29  ;;  %v326_v33 = vld [vmem:[#allocation2 + $0x1d0] sm:$0xff]  ;;  %v329_v34 = vld [vmem:[#allocation2 + $0x1e8] sm:$0xff] }
  0x2a   :  { %976 = vmatpush1.bf16.msra.mxu1 %v975_v40  ;;  %v331_v35 = vld [vmem:[#allocation2 + $0x1f8] sm:$0xff]  ;;  %v1015_v36 = vpack.c.bf16 %v326_v33, %v324_v31  ;;  %v328_v38 = vld [vmem:[#allocation2 + $0x1e0] sm:$0xff]  ;;  %v330_v39 = vld [vmem:[#allocation2 + $0x1f0] sm:$0xff] }
  0x2b   :  { %978 = vmatprep.subr.bf16.mxu1 %v977_v41  ;;  %v1017_v37 = vpack.c.bf16 %v331_v35, %v329_v34  ;;  %v333_v40 = vld [vmem:[#allocation2 + $0x208] sm:$0xff]  ;;  %1014 = vmatprep.subr.bf16.mxu0 %v1013_v32  ;;  %v335_v41 = vld [vmem:[#allocation2 + $0x218] sm:$0xff]  ;;  %v1019_v42 = vpack.c.bf16 %v330_v39, %v328_v38  ;;  %v334_v45 = vld [vmem:[#allocation2 + $0x210] sm:$0xff] }
  0x2c   :  { %1016 = vmatpush1.bf16.msra.mxu0 %v1015_v36  ;;  %v1021_v43 = vpack.c.bf16 %v335_v41, %v333_v40  ;;  %v337_v46 = vld [vmem:[#allocation2 + $0x228] sm:$0xff]  ;;  %v338_v51 = vld [vmem:[#allocation2 + $0x230] sm:$0xff]  ;;  %v351_v23 = vld [vmem:[#allocation2 + $0x298] sm:$0xff] }
  0x2d   :  { %1018 = vmatprep.subr.bf16.mxu0 %v1017_v37  ;;  %v341_v52 = vld [vmem:[#allocation2 + $0x248] sm:$0xff]  ;;  %v342_v57 = vld [vmem:[#allocation2 + $0x250] sm:$0xff]  ;;  %v355_v29 = vld [vmem:[#allocation2 + $0x2b8] sm:$0xff] }
  0x2e   :  { %980 = vmatpush1.bf16.msra.mxu1 %v979_v44  ;;  %v332_v44 = vld [vmem:[#allocation2 + $0x200] sm:$0xff]  ;;  %v345_v58 = vld [vmem:[#allocation2 + $0x268] sm:$0xff]  ;;  %v346_v63 = vld [vmem:[#allocation2 + $0x270] sm:$0xff] }
  0x2f   :  { %982 = vmatprep.subr.bf16.mxu1 %v981_v47  ;;  %v339_v47 = vld [vmem:[#allocation2 + $0x238] sm:$0xff]  ;;  %v1023_v48 = vpack.c.bf16 %v334_v45, %v332_v44  ;;  %v350_v26 = vld [vmem:[#allocation2 + $0x290] sm:$0xff]  ;;  %v352_v31 = vld [vmem:[#allocation2 + $0x2a0] sm:$0xff] }
  0x30   :  { %1020 = vmatpush1.bf16.msra.mxu0 %v1019_v42  ;;  %v1025_v49 = vpack.c.bf16 %v339_v47, %v337_v46  ;;  %v354_v32 = vld [vmem:[#allocation2 + $0x2b0] sm:$0xff]  ;;  %v357_v34 = vld [vmem:[#allocation2 + $0x2c8] sm:$0xff]  ;;  %v359_v35 = vld [vmem:[#allocation2 + $0x2d8] sm:$0xff] }
  0x31   :  { %1022 = vmatprep.subr.bf16.mxu0 %v1021_v43  ;;  %v1043_v33 = vpack.c.bf16 %v354_v32, %v352_v31  ;;  %v1045_v36 = vpack.c.bf16 %v359_v35, %v357_v34  ;;  %v356_v37 = vld [vmem:[#allocation2 + $0x2c0] sm:$0xff]  ;;  %v358_v38 = vld [vmem:[#allocation2 + $0x2d0] sm:$0xff]  ;;  %v361_v40 = vld [vmem:[#allocation2 + $0x2e8] sm:$0xff] }
  0x32   :  { %984 = vmatpush1.bf16.msra.mxu1 %v983_v50  ;;  %v336_v50 = vld [vmem:[#allocation2 + $0x220] sm:$0xff]  ;;  %v1047_v39 = vpack.c.bf16 %v358_v38, %v356_v37  ;;  %v363_v41 = vld [vmem:[#allocation2 + $0x2f8] sm:$0xff]  ;;  %v362_v44 = vld [vmem:[#allocation2 + $0x2f0] sm:$0xff] }
  0x33   :  { %986 = vmatprep.subr.bf16.mxu1 %v985_v53  ;;  %v343_v53 = vld [vmem:[#allocation2 + $0x258] sm:$0xff]  ;;  %v1027_v54 = vpack.c.bf16 %v338_v51, %v336_v50  ;;  %v1049_v42 = vpack.c.bf16 %v363_v41, %v361_v40  ;;  %v360_v43 = vld [vmem:[#allocation2 + $0x2e0] sm:$0xff]  ;;  %v365_v46 = vld [vmem:[#allocation2 + $0x308] sm:$0xff] }
  0x34   :  { %1024 = vmatpush1.bf16.msra.mxu0 %v1023_v48  ;;  %v1029_v55 = vpack.c.bf16 %v343_v53, %v341_v52  ;;  %v1051_v45 = vpack.c.bf16 %v362_v44, %v360_v43  ;;  %v367_v47 = vld [vmem:[#allocation2 + $0x318] sm:$0xff]  ;;  %v366_v50 = vld [vmem:[#allocation2 + $0x310] sm:$0xff]  ;;  %v369_v52 = vld [vmem:[#allocation2 + $0x328] sm:$0xff] }
  0x35   :  { %1026 = vmatprep.subr.bf16.mxu0 %v1025_v49  ;;  %v1053_v48 = vpack.c.bf16 %v367_v47, %v365_v46  ;;  %v364_v49 = vld [vmem:[#allocation2 + $0x300] sm:$0xff]  ;;  %v371_v53 = vld [vmem:[#allocation2 + $0x338] sm:$0xff]  ;;  %v499_v31 = vld [vmem:[#allocation2 + $0x408] sm:$0xff] }
  0x36   :  { %988 = vmatpush1.bf16.msra.mxu1 %v987_v56  ;;  %v340_v56 = vld [vmem:[#allocation2 + $0x240] sm:$0xff]  ;;  %v1055_v51 = vpack.c.bf16 %v366_v50, %v364_v49  ;;  %v501_v32 = vld [vmem:[#allocation2 + $0x418] sm:$0xff]  ;;  %v503_v37 = vld [vmem:[#allocation2 + $0x428] sm:$0xff] }
  0x37   :  { %990 = vmatprep.subr.bf16.mxu1 %v989_v59  ;;  %v347_v59 = vld [vmem:[#allocation2 + $0x278] sm:$0xff]  ;;  %v1031_v60 = vpack.c.bf16 %v342_v57, %v340_v56  ;;  %v370_v56 = vld [vmem:[#allocation2 + $0x330] sm:$0xff]  ;;  %v1085_v34 = vpack.c.bf16 %v501_v32, %v499_v31  ;;  %v498_v35 = vld [vmem:[#allocation2 + $0x400] sm:$0xff] }
  0x38   :  { %1028 = vmatpush1.bf16.msra.mxu0 %v1027_v54  ;;  %v1033_v61 = vpack.c.bf16 %v347_v59, %v345_v58  ;;  %v1057_v54 = vpack.c.bf16 %v371_v53, %v369_v52  ;;  %v373_v58 = vld [vmem:[#allocation2 + $0x348] sm:$0xff]  ;;  %v375_v59 = vld [vmem:[#allocation2 + $0x358] sm:$0xff]  ;;  %v502_v41 = vld [vmem:[#allocation2 + $0x420] sm:$0xff] }
  0x39   :  { %1030 = vmatprep.subr.bf16.mxu0 %v1029_v55  ;;  %v368_v55 = vld [vmem:[#allocation2 + $0x320] sm:$0xff]  ;;  %v505_v38 = vld [vmem:[#allocation2 + $0x438] sm:$0xff] }
  0x3a   :  { %992 = vmatpush1.bf16.msra.mxu1 %v991_v62  ;;  %v344_v62 = vld [vmem:[#allocation2 + $0x260] sm:$0xff]  ;;  %v1059_v57 = vpack.c.bf16 %v370_v56, %v368_v55  ;;  %v1089_v40 = vpack.c.bf16 %v505_v38, %v503_v37 }
  0x3b   :  { %994 = vmatprep.subr.bf16.mxu1 %v993_v1  ;;  %v1035_v0 = vpack.c.bf16 %v346_v63, %v344_v62  ;;  %v60_v1 = vlaneseq  ;;  %v374_v62 = vld [vmem:[#allocation2 + $0x350] sm:$0xff]  ;;  %v222_v44 = vld [vmem:[%s1667_s4] sm:$0x3] }
  0x3c   :  { %1032 = vmatpush1.bf16.msra.mxu0 %v1031_v60  ;;  %v1061_v60 = vpack.c.bf16 %v375_v59, %v373_v58  ;;  %v526_v32 = vld [vmem:[#allocation2 + $0x4e0] sm:$0xff] }
  0x3d   :  { %1034 = vmatprep.subr.bf16.mxu0 %v1033_v61  ;;  %v61_v2 = vshrl.u32 %v60_v1, 7  ;;  %v372_v61 = vld [vmem:[#allocation2 + $0x340] sm:$0xff]  ;;  %v379_v1 = vld [vmem:[#allocation2 + $0x378] sm:$0xff] }
  0x3e   :  { %996 = vmatpush1.bf16.msra.mxu1 %v995_v4  ;;  %v58_v4 = vld [vmem:[%s1665_s2] sm:$0x3]  ;;  %v1063_v63 = vpack.c.bf16 %v374_v62, %v372_v61  ;;  %v507_v61 = vld [vmem:[#allocation2 + $0x448] sm:$0xff]  ;;  %v509_v62 = vld [vmem:[#allocation2 + $0x458] sm:$0xff] }
  0x3f   :  { %998 = vmatprep.subr.bf16.mxu1 %v997_v7  ;;  %v1412_v3 = vsub.s32 0, %v61_v2  ;;  %v1417_v5 = vsub.s32 1, %v61_v2  ;;  %v530_v38 = vld [vmem:[#allocation2 + $0x500] sm:$0xff] }
  0x40   :  { %1036 = vmatpush1.bf16.msra.mxu0 %v1035_v0  ;;  %v377_v0 = vld [vmem:[#allocation2 + $0x368] sm:$0xff] }
  0x41   :  { %v63_v6 = vrot.slane %v58_v4, %v1412_v3  ;;  %v67_v7 = vrot.slane %v58_v4, %v1417_v5  ;;  %v1065_v2 = vpack.c.bf16 %v379_v1, %v377_v0  ;;  %v376_v4 = vld [vmem:[#allocation2 + $0x360] sm:$0xff]  ;;  %v231_v46 = vrot.slane %v222_v44, %v1417_v5  ;;  %v508_v1 = vld [vmem:[#allocation2 + $0x450] sm:$0xff] }
  0x42   :  { %1000 = vmatpush1.bf16.msra.mxu1 %v999_v10  ;;  %v506_v0 = vld [vmem:[#allocation2 + $0x440] sm:$0xff] }
  0x43   :  { %1002 = vmatprep.subr.bf16.mxu1 %v1001_v13 }
  0x46   :  { %1004 = vmatpush1.bf16.msra.mxu1 %v1003_v16 }
  0x47   :  { %1006 = vmatprep.subr.bf16.mxu1 %v1005_v19 }
  0x4a   :  { %1008 = vmatpush1.bf16.msra.mxu1 %v1007_v22  ;;  %v349_v22 = vld [vmem:[#allocation2 + $0x288] sm:$0xff] }
  0x4b   :  { %1010 = vmatprep.subr.bf16.mxu1 %v1009_v25  ;;  %v1037_v24 = vpack.c.bf16 %v351_v23, %v349_v22  ;;  %v348_v25 = vld [vmem:[#allocation2 + $0x280] sm:$0xff] }
  0x4c   :  { %v1039_v27 = vpack.c.bf16 %v350_v26, %v348_v25  ;;  %v490_v23 = vld [vmem:[#allocation2 + $0x3c0] sm:$0xff]  ;;  %v495_v25 = vld [vmem:[#allocation2 + $0x3e8] sm:$0xff]  ;;  %v497_v26 = vld [vmem:[#allocation2 + $0x3f8] sm:$0xff] }
  0x4d   :  { %1038 = vmatprep.subr.bf16.mxu0 %v1037_v24  ;;  %v492_v24 = vld [vmem:[#allocation2 + $0x3d0] sm:$0xff] }
  0x4e   :  { %1012 = vmatpush1.bf16.msra.mxu1 %v1011_v28  ;;  %1040 = vmatpush1.bf16.msra.mxu0 %v1039_v27  ;;  %v353_v28 = vld [vmem:[#allocation2 + $0x2a8] sm:$0xff]  ;;  %v1079_v27 = vpack.c.bf16 %v492_v24, %v490_v23  ;;  %v525_v24 = vld [vmem:[#allocation2 + $0x4d8] sm:$0xff] }
  0x4f   :  { %v1041_v30 = vpack.c.bf16 %v355_v29, %v353_v28  ;;  %v1081_v28 = vpack.c.bf16 %v497_v26, %v495_v25  ;;  %v494_v29 = vld [vmem:[#allocation2 + $0x3e0] sm:$0xff]  ;;  %v523_v23 = vld [vmem:[#allocation2 + $0x4c8] sm:$0xff] }
  0x50   :  { %v1109_v25 = vpack.c.bf16 %v525_v24, %v523_v23  ;;  %v522_v26 = vld [vmem:[#allocation2 + $0x4c0] sm:$0xff]  ;;  %v749_v24 = vld [vmem:[%s1669_s6 + $0x10] sm:$0xff] }
  0x51   :  { %1042 = vmatprep.subr.bf16.mxu0 %v1041_v30  ;;  %v496_v30 = vld [vmem:[#allocation2 + $0x3f0] sm:$0xff] }
  0x52   :  { %1044 = vmatpush1.bf16.msra.mxu0 %v1043_v33  ;;  %v1083_v33 = vpack.c.bf16 %v496_v30, %v494_v29  ;;  %v527_v29 = vld [vmem:[#allocation2 + $0x4e8] sm:$0xff]  ;;  %v529_v30 = vld [vmem:[#allocation2 + $0x4f8] sm:$0xff] }
  0x53   :  { %1046 = vmatprep.subr.bf16.mxu0 %v1045_v36  ;;  %v500_v36 = vld [vmem:[#allocation2 + $0x410] sm:$0xff]  ;;  %v1113_v31 = vpack.c.bf16 %v529_v30, %v527_v29 }
  0x54   :  { %v753_v30 = vld [vmem:[%s1669_s6 + $0x30] sm:$0xff] }
  0x56   :  { %1048 = vmatpush1.bf16.msra.mxu0 %v1047_v39  ;;  %v1087_v39 = vpack.c.bf16 %v500_v36, %v498_v35  ;;  %v531_v35 = vld [vmem:[#allocation2 + $0x508] sm:$0xff]  ;;  %v533_v36 = vld [vmem:[#allocation2 + $0x518] sm:$0xff] }
  0x57   :  { %1050 = vmatprep.subr.bf16.mxu0 %v1049_v42  ;;  %v504_v42 = vld [vmem:[#allocation2 + $0x430] sm:$0xff]  ;;  %v1117_v37 = vpack.c.bf16 %v533_v36, %v531_v35 }
  0x58   :  { %v1091_v43 = vpack.c.bf16 %v504_v42, %v502_v41  ;;  %v535_v41 = vld [vmem:[#allocation2 + $0x528] sm:$0xff]  ;;  %v537_v42 = vld [vmem:[#allocation2 + $0x538] sm:$0xff]  ;;  %v757_v36 = vld [vmem:[%s1669_s6 + $0x50] sm:$0xff] }
  0x5a   :  { %1052 = vmatpush1.bf16.msra.mxu0 %v1051_v45  ;;  %v227_v45 = vrot.slane %v222_v44, %v1412_v3  ;;  %v534_v44 = vld [vmem:[#allocation2 + $0x520] sm:$0xff] }
  0x5b   :  { %1054 = vmatprep.subr.bf16.mxu0 %v1053_v48 }
  0x5e   :  { %1056 = vmatpush1.bf16.msra.mxu0 %v1055_v51 }
  0x5f   :  { %1058 = vmatprep.subr.bf16.mxu0 %v1057_v54 }
  0x62   :  { %1060 = vmatpush1.bf16.msra.mxu0 %v1059_v57 }
  0x63   :  { %1062 = vmatprep.subr.bf16.mxu0 %v1061_v60 }
  0x66   :  { %1064 = vmatpush1.bf16.msra.mxu0 %v1063_v63  ;;  %v1093_v63 = vpack.c.bf16 %v509_v62, %v507_v61  ;;  %v648_v61 = vld [vmem:[%s1668_s5 + $0x48] sm:$0xff] }
  0x67   :  { %1066 = vmatprep.subr.bf16.mxu0 %v1065_v2  ;;  %v1095_v2 = vpack.c.bf16 %v508_v1, %v506_v0  ;;  %v650_v0 = vld [vmem:[%s1668_s5 + $0x58] sm:$0xff] }
  0xee   :  { %v147_v8 = vpop.f32.mrb[0].mxu0 }
  0xef   :  { %v148_v9 = vadd.f32 %v147_v8, %v63_v6  ;;  %v149_v10 = vpop.f32.mrb[1].mxu0  ;;  %v378_v6 = vld [vmem:[#allocation2 + $0x370] sm:$0xff]  ;;  %v483_v8 = vld [vmem:[#allocation2 + $0x388] sm:$0xff] }
  0xf0   :  { %v150_v11 = vadd.f32 %v149_v10, %v67_v7  ;;  %v1067_v7 = vpack.c.bf16 %v378_v6, %v376_v4  ;;  %v482_v10 = vld [vmem:[#allocation2 + $0x380] sm:$0xff]  ;;  %v511_v4 = vld [vmem:[#allocation2 + $0x468] sm:$0xff]  ;;  %v513_v6 = vld [vmem:[#allocation2 + $0x478] sm:$0xff] }
  0xf1   :  { %v932_v12 = vmul.f32 -1.442695, %v148_v9 }
  0xf2   :  { %v933_v13 = vmul.f32 -1.442695, %v150_v11  ;;  %1068 = vmatpush1.bf16.msra.mxu0 %v1067_v7  ;;  %v1097_v7 = vpack.c.bf16 %v513_v6, %v511_v4 }
  0xf3   :  { %1218 = vpow2.f32 %v932_v12  ;;  %v484_v12 = vld [vmem:[#allocation2 + $0x390] sm:$0xff] }
  0xf4   :  { %1220 = vpow2.f32 %v933_v13  ;;  %v487_v13 = vld [vmem:[#allocation2 + $0x3a8] sm:$0xff] }
  0xfd   :  { %v1219_v14 = vpop.eup %1218 }
  0xfe   :  { %v1221_v15 = vpop.eup %1220  ;;  %v158_v16 = vadd.f32 1.0, %v1219_v14  ;;  %v489_v14 = vld [vmem:[#allocation2 + $0x3b8] sm:$0xff] }
  0xff   :  { %v159_v17 = vadd.f32 1.0, %v1221_v15  ;;  %v1071_v15 = vpack.c.bf16 %v484_v12, %v482_v10  ;;  %v517_v12 = vld [vmem:[#allocation2 + $0x498] sm:$0xff] }
 0x100   :  { %1222 = vrcp.f32 %v158_v16  ;;  %v1073_v16 = vpack.c.bf16 %v489_v14, %v487_v13  ;;  %v514_v14 = vld [vmem:[#allocation2 + $0x480] sm:$0xff] }
 0x101   :  { %1224 = vrcp.f32 %v159_v17  ;;  %v486_v17 = vld [vmem:[#allocation2 + $0x3a0] sm:$0xff] }
 0x10a   :  { %v1223_v18 = vpop.eup %1222 }
 0x10b   :  { %v1225_v19 = vpop.eup %1224  ;;  %v164_v21 = vmul.f32 %v1223_v18, %v148_v9  ;;  %v485_v9 = vld [vmem:[#allocation2 + $0x398] sm:$0xff]  ;;  %v488_v18 = vld [vmem:[#allocation2 + $0x3b0] sm:$0xff] }
 0x10c   :  { %v165_v20 = vmul.f32 %v1225_v19, %v150_v11  ;;  %v1069_v11 = vpack.c.bf16 %v485_v9, %v483_v8  ;;  %v491_v19 = vld [vmem:[#allocation2 + $0x3c8] sm:$0xff]  ;;  %v510_v8 = vld [vmem:[#allocation2 + $0x460] sm:$0xff]  ;;  %v512_v9 = vld [vmem:[#allocation2 + $0x470] sm:$0xff] }
 0x10d   :  { %v1099_v10 = vpack.c.bf16 %v512_v9, %v510_v8 }
 0x10e   :  { %934 = vmatprep.mubr.msk.f32.mxu1 %vm234_vm4, %v165_v20  ;;  %1070 = vmatprep.subr.bf16.mxu1 %v1069_v11  ;;  %v493_v20 = vld [vmem:[#allocation2 + $0x3d8] sm:$0xff]  ;;  %v515_v11 = vld [vmem:[#allocation2 + $0x488] sm:$0xff] }
 0x10f   :  { %303 = vmatmul.mubr.f32.vlgmr.msra.gmra.mrb[0].mxu1 %v164_v21  ;;  %v1075_v21 = vpack.c.bf16 %v488_v18, %v486_v17  ;;  %v1077_v22 = vpack.c.bf16 %v493_v20, %v491_v19  ;;  %v1101_v13 = vpack.c.bf16 %v517_v12, %v515_v11  ;;  %v519_v17 = vld [vmem:[#allocation2 + $0x4a8] sm:$0xff]  ;;  %v521_v18 = vld [vmem:[#allocation2 + $0x4b8] sm:$0xff]  ;;  %v518_v20 = vld [vmem:[#allocation2 + $0x4a0] sm:$0xff] }
 0x110   :  { %1072 = vmatpush1.bf16.msra.mxu1 %v1071_v15  ;;  %v516_v15 = vld [vmem:[#allocation2 + $0x490] sm:$0xff]  ;;  %v1105_v19 = vpack.c.bf16 %v521_v18, %v519_v17  ;;  %v747_v17 = vld [vmem:[%s1669_s6] sm:$0xff]  ;;  %v748_v18 = vld [vmem:[%s1669_s6 + $0x8] sm:$0xff] }
 0x111   :  { %1074 = vmatprep.subr.bf16.mxu1 %v1073_v16  ;;  %v1103_v16 = vpack.c.bf16 %v516_v15, %v514_v14 }
 0x114   :  { %1076 = vmatpush1.bf16.msra.mxu1 %v1075_v21  ;;  %v520_v21 = vld [vmem:[#allocation2 + $0x4b0] sm:$0xff] }
 0x115   :  { %1078 = vmatprep.subr.bf16.mxu1 %v1077_v22  ;;  %v1107_v22 = vpack.c.bf16 %v520_v21, %v518_v20 }
 0x118   :  { %1080 = vmatpush1.bf16.msra.mxu1 %v1079_v27  ;;  %v524_v27 = vld [vmem:[#allocation2 + $0x4d0] sm:$0xff] }
 0x119   :  { %1082 = vmatprep.subr.bf16.mxu1 %v1081_v28  ;;  %v1111_v28 = vpack.c.bf16 %v524_v27, %v522_v26  ;;  %v751_v27 = vld [vmem:[%s1669_s6 + $0x20] sm:$0xff] }
 0x11c   :  { %1084 = vmatpush1.bf16.msra.mxu1 %v1083_v33  ;;  %v528_v33 = vld [vmem:[#allocation2 + $0x4f0] sm:$0xff] }
 0x11d   :  { %1086 = vmatprep.subr.bf16.mxu1 %v1085_v34  ;;  %v1115_v34 = vpack.c.bf16 %v528_v33, %v526_v32  ;;  %v755_v33 = vld [vmem:[%s1669_s6 + $0x40] sm:$0xff] }
 0x120   :  { %1088 = vmatpush1.bf16.msra.mxu1 %v1087_v39  ;;  %v532_v39 = vld [vmem:[#allocation2 + $0x510] sm:$0xff] }
 0x121   :  { %1090 = vmatprep.subr.bf16.mxu1 %v1089_v40  ;;  %v1119_v40 = vpack.c.bf16 %v532_v39, %v530_v38  ;;  %v651_v39 = vld [vmem:[%s1668_s5 + $0x60] sm:$0xff] }
 0x124   :  { %1092 = vmatpush1.bf16.msra.mxu1 %v1091_v43  ;;  %v1121_v43 = vpack.c.bf16 %v537_v42, %v535_v41  ;;  %v759_v41 = vld [vmem:[%s1669_s6 + $0x60] sm:$0xff] }
 0x125   :  { %1094 = vmatprep.subr.bf16.mxu1 %v1093_v63  ;;  %v649_v63 = vld [vmem:[%s1668_s5 + $0x50] sm:$0xff] }
 0x126   :  { %v1141_v1 = vpack.c.bf16 %v650_v0, %v649_v63  ;;  %v659_v0 = vld [vmem:[%s1668_s5 + $0xa0] sm:$0xff] }
 0x128   :  { %1096 = vmatpush1.bf16.msra.mxu1 %v1095_v2  ;;  %v937_v2 = vld [vmem:[%s1667_s4 + $0x2] sm:$0x3] }
 0x129   :  { %1098 = vmatprep.subr.bf16.mxu1 %v1097_v7  ;;  %v386_v4 = vrot.slane %v937_v2, %v1412_v3  ;;  %v390_v6 = vrot.slane %v937_v2, %v1417_v5  ;;  %v767_v2 = vld [vmem:[%s1669_s6 + $0xa0] sm:$0xff] }
 0x12c   :  { %1100 = vmatpush1.bf16.msra.mxu1 %v1099_v10 }
 0x12d   :  { %1102 = vmatprep.subr.bf16.mxu1 %v1101_v13 }
 0x130   :  { %1104 = vmatpush1.bf16.msra.mxu1 %v1103_v16 }
 0x131   :  { %1106 = vmatprep.subr.bf16.mxu1 %v1105_v19 }
 0x134   :  { %1108 = vmatpush1.bf16.msra.mxu1 %v1107_v22  ;;  %v1168_v22 = vpack.c.bf16 %v748_v18, %v747_v17  ;;  %v772_v18 = vld [vmem:[%s1669_s6 + $0xc8] sm:$0xff] }
 0x135   :  { %1110 = vmatprep.subr.bf16.mxu1 %v1109_v25  ;;  %v750_v25 = vld [vmem:[%s1669_s6 + $0x18] sm:$0xff] }
 0x136   :  { %v1171_v26 = vpack.c.bf16 %v750_v25, %v749_v24  ;;  %v774_v24 = vld [vmem:[%s1669_s6 + $0xd8] sm:$0xff] }
 0x138   :  { %1112 = vmatpush1.bf16.msra.mxu1 %v1111_v28  ;;  %v752_v28 = vld [vmem:[%s1669_s6 + $0x28] sm:$0xff] }
 0x139   :  { %1114 = vmatprep.subr.bf16.mxu1 %v1113_v31  ;;  %v1174_v29 = vpack.c.bf16 %v752_v28, %v751_v27  ;;  %v754_v31 = vld [vmem:[%s1669_s6 + $0x38] sm:$0xff] }
 0x13a   :  { %v1177_v32 = vpack.c.bf16 %v754_v31, %v753_v30 }
 0x13c   :  { %1116 = vmatpush1.bf16.msra.mxu1 %v1115_v34  ;;  %v756_v34 = vld [vmem:[%s1669_s6 + $0x48] sm:$0xff] }
 0x13d   :  { %1118 = vmatprep.subr.bf16.mxu1 %v1117_v37  ;;  %v1180_v35 = vpack.c.bf16 %v756_v34, %v755_v33  ;;  %v758_v37 = vld [vmem:[%s1669_s6 + $0x58] sm:$0xff] }
 0x13e   :  { %v1183_v38 = vpack.c.bf16 %v758_v37, %v757_v36 }
 0x140   :  { %1120 = vmatpush1.bf16.msra.mxu1 %v1119_v40  ;;  %v652_v40 = vld [vmem:[%s1668_s5 + $0x68] sm:$0xff] }
 0x141   :  { %1122 = vmatprep.subr.bf16.mxu1 %v1121_v43  ;;  %v1144_v42 = vpack.c.bf16 %v652_v40, %v651_v39  ;;  %v760_v43 = vld [vmem:[%s1669_s6 + $0x68] sm:$0xff] }
 0x1e2   :  { %v304_v47 = vpop.f32.mrb[0].mxu1 }
 0x1e3   :  { %v305_v48 = vadd.f32 %v304_v47, %v227_v45  ;;  %v306_v49 = vpop.f32.mrb[1].mxu1  ;;  %v536_v45 = vld [vmem:[#allocation2 + $0x530] sm:$0xff]  ;;  %v639_v47 = vld [vmem:[%s1668_s5] sm:$0xff] }
 0x1e4   :  { %v307_v50 = vadd.f32 %v306_v49, %v231_v46  ;;  %v1123_v46 = vpack.c.bf16 %v536_v45, %v534_v44  ;;  %v1313_v49 = vmov 0.0|0.0   ;;  %v1186_v44 = vpack.c.bf16 %v760_v43, %v759_v41  ;;  %v653_v45 = vld [vmem:[%s1668_s5 + $0x70] sm:$0xff]  ;;  %v947_v41 = vld [vmem:[%s1671_s8] ss:$0 sm:$0xff] }
 0x1e5   :  { %v935_v51 = vmul.f32 -1.442695, %v305_v48  ;;  %1125 = vmatprep.subr.bf16.mxu0 %v1313_v49 }
 0x1e6   :  { %v936_v52 = vmul.f32 -1.442695, %v307_v50  ;;  %1124 = vmatpush1.bf16.msra.mxu1 %v1123_v46  ;;  %v654_v46 = vld [vmem:[%s1668_s5 + $0x78] sm:$0xff] }
 0x1e7   :  { %1226 = vpow2.f32 %v935_v51  ;;  %1167 = vmatprep.subr.bf16.mxu1 %v1313_v49  ;;  %v641_v51 = vld [vmem:[%s1668_s5 + $0x10] sm:$0xff] }
 0x1e8   :  { %1228 = vpow2.f32 %v936_v52  ;;  %v642_v52 = vld [vmem:[%s1668_s5 + $0x18] sm:$0xff] }
 0x1f1   :  { %v1227_v53 = vpop.eup %1226 }
 0x1f2   :  { %v1229_v54 = vpop.eup %1228  ;;  %v315_v55 = vadd.f32 1.0, %v1227_v53  ;;  %v1129_v53 = vpack.c.bf16 %v642_v52, %v641_v51  ;;  %v655_v52 = vld [vmem:[%s1668_s5 + $0x80] sm:$0xff] }
 0x1f3   :  { %v316_v56 = vadd.f32 1.0, %v1229_v54  ;;  %v643_v54 = vld [vmem:[%s1668_s5 + $0x20] sm:$0xff] }
 0x1f4   :  { %1230 = vrcp.f32 %v315_v55  ;;  %v644_v55 = vld [vmem:[%s1668_s5 + $0x28] sm:$0xff] }
 0x1f5   :  { %1232 = vrcp.f32 %v316_v56  ;;  %v1132_v56 = vpack.c.bf16 %v644_v55, %v643_v54  ;;  %v763_v54 = vld [vmem:[%s1669_s6 + $0x80] sm:$0xff] }
 0x1fe   :  { %v1231_v57 = vpop.eup %1230 }
 0x1ff   :  { %v1233_v58 = vpop.eup %1232  ;;  %v321_v60 = vmul.f32 %v1231_v57, %v305_v48  ;;  %v640_v48 = vld [vmem:[%s1668_s5 + $0x8] sm:$0xff]  ;;  %v645_v57 = vld [vmem:[%s1668_s5 + $0x30] sm:$0xff] }
 0x200   :  { %v322_v59 = vmul.f32 %v1233_v58, %v307_v50  ;;  %v1126_v50 = vpack.c.bf16 %v640_v48, %v639_v47  ;;  %v646_v58 = vld [vmem:[%s1668_s5 + $0x38] sm:$0xff]  ;;  %v761_v47 = vld [vmem:[%s1669_s6 + $0x70] sm:$0xff]  ;;  %v1147_v48 = vpack.c.bf16 %v654_v46, %v653_v45 }
 0x202   :  { %938 = vmatprep.mubr.msk.f32.mxu0 %vm234_vm4, %v322_v59  ;;  %v1135_v59 = vpack.c.bf16 %v646_v58, %v645_v57  ;;  %v657_v58 = vld [vmem:[%s1668_s5 + $0x90] sm:$0xff] }
 0x203   :  { %461 = vmatmul.mubr.f32.vlgmr.msra.gmra.mrb[2].mxu0 %v321_v60  ;;  %v647_v60 = vld [vmem:[%s1668_s5 + $0x40] sm:$0xff] }
 0x204   :  { %1127 = vmatpush1.bf16.msra.mxu0 %v1126_v50  ;;  %v1138_v62 = vpack.c.bf16 %v648_v61, %v647_v60  ;;  %v762_v50 = vld [vmem:[%s1669_s6 + $0x78] sm:$0xff]  ;;  %v765_v60 = vld [vmem:[%s1669_s6 + $0x90] sm:$0xff] }
 0x205   :  { %1128 = vmatprep.subr.bf16.mxu0 %v1313_v49  ;;  %v1189_v51 = vpack.c.bf16 %v762_v50, %v761_v47 }
 0x208   :  { %1130 = vmatpush1.bf16.msra.mxu0 %v1129_v53  ;;  %v656_v53 = vld [vmem:[%s1668_s5 + $0x88] sm:$0xff] }
 0x209   :  { %1131 = vmatprep.subr.bf16.mxu0 %v1313_v49  ;;  %v1150_v55 = vpack.c.bf16 %v656_v53, %v655_v52 }
 0x20c   :  { %1133 = vmatpush1.bf16.msra.mxu0 %v1132_v56  ;;  %v764_v56 = vld [vmem:[%s1669_s6 + $0x88] sm:$0xff] }
 0x20d   :  { %1134 = vmatprep.subr.bf16.mxu0 %v1313_v49  ;;  %v1192_v57 = vpack.c.bf16 %v764_v56, %v763_v54 }
 0x210   :  { %1136 = vmatpush1.bf16.msra.mxu0 %v1135_v59  ;;  %v658_v59 = vld [vmem:[%s1668_s5 + $0x98] sm:$0xff] }
 0x211   :  { %1137 = vmatprep.subr.bf16.mxu0 %v1313_v49  ;;  %v1153_v61 = vpack.c.bf16 %v658_v59, %v657_v58 }
 0x214   :  { %1139 = vmatpush1.bf16.msra.mxu0 %v1138_v62  ;;  %v766_v62 = vld [vmem:[%s1669_s6 + $0x98] sm:$0xff] }
 0x215   :  { %1140 = vmatprep.subr.bf16.mxu0 %v1313_v49  ;;  %v1195_v63 = vpack.c.bf16 %v766_v62, %v765_v60 }
 0x218   :  { %1142 = vmatpush1.bf16.msra.mxu0 %v1141_v1  ;;  %v660_v1 = vld [vmem:[%s1668_s5 + $0xa8] sm:$0xff] }
 0x219   :  { %1143 = vmatprep.subr.bf16.mxu0 %v1313_v49 }
 0x21c   :  { %1145 = vmatpush1.bf16.msra.mxu0 %v1144_v42 }
 0x21d   :  { %1146 = vmatprep.subr.bf16.mxu0 %v1313_v49 }
 0x220   :  { %1148 = vmatpush1.bf16.msra.mxu0 %v1147_v48 }
 0x221   :  { %1149 = vmatprep.subr.bf16.mxu0 %v1313_v49 }
 0x224   :  { %1151 = vmatpush1.bf16.msra.mxu0 %v1150_v55 }
 0x225   :  { %1152 = vmatprep.subr.bf16.mxu0 %v1313_v49 }
 0x228   :  { %1154 = vmatpush1.bf16.msra.mxu0 %v1153_v61 }
 0x229   :  { %1155 = vmatprep.subr.bf16.mxu0 %v1313_v49 }
 0x2d6   :  { %v462_v7 = vpop.f32.mrb[2].mxu0 }
 0x2d7   :  { %v463_v8 = vadd.f32 %v462_v7, %v386_v4  ;;  %v464_v9 = vpop.f32.mrb[3].mxu0  ;;  %v1156_v4 = vpack.c.bf16 %v660_v1, %v659_v0  ;;  %v950_v1 = vld [vmem:[%s1673_s10] ss:$0 sm:$0xff] }
 0x2d8   :  { %v465_v10 = vadd.f32 %v464_v9, %v390_v6  ;;  %v768_v6 = vld [vmem:[%s1669_s6 + $0xa8] sm:$0xff]  ;;  %v662_v9 = vld [vmem:[%s1668_s5 + $0xb8] sm:$0xff] }
 0x2d9   :  { %v939_v11 = vmul.f32 -1.442695, %v463_v8  ;;  %v1198_v7 = vpack.c.bf16 %v768_v6, %v767_v2  ;;  %1157 = vmatpush1.bf16.msra.mxu0 %v1156_v4 }
 0x2da   :  { %v940_v12 = vmul.f32 -1.442695, %v465_v10  ;;  %1158 = vmatprep.subr.bf16.mxu0 %v1313_v49 }
 0x2db   :  { %1234 = vpow2.f32 %v939_v11 }
 0x2dc   :  { %1236 = vpow2.f32 %v940_v12  ;;  %v770_v12 = vld [vmem:[%s1669_s6 + $0xb8] sm:$0xff] }
 0x2e5   :  { %v1235_v13 = vpop.eup %1234 }
 0x2e6   :  { %v1237_v14 = vpop.eup %1236  ;;  %v473_v15 = vadd.f32 1.0, %v1235_v13 }
 0x2e7   :  { %v474_v16 = vadd.f32 1.0, %v1237_v14  ;;  %v663_v14 = vld [vmem:[%s1668_s5 + $0xc0] sm:$0xff] }
 0x2e8   :  { %1238 = vrcp.f32 %v473_v15  ;;  %v664_v15 = vld [vmem:[%s1668_s5 + $0xc8] sm:$0xff] }
 0x2e9   :  { %1240 = vrcp.f32 %v474_v16  ;;  %v771_v16 = vld [vmem:[%s1669_s6 + $0xc0] sm:$0xff]  ;;  %v1162_v17 = vpack.c.bf16 %v664_v15, %v663_v14 }
 0x2f2   :  { %v1239_v19 = vpop.eup %1238 }
 0x2f3   :  { %v1241_v20 = vpop.eup %1240  ;;  %v479_v23 = vmul.f32 %v1239_v19, %v463_v8  ;;  %v661_v8 = vld [vmem:[%s1668_s5 + $0xb0] sm:$0xff]  ;;  %v1204_v19 = vpack.c.bf16 %v772_v18, %v771_v16 }
 0x2f4   :  { %v480_v21 = vmul.f32 %v1241_v20, %v465_v10  ;;  %v769_v10 = vld [vmem:[%s1669_s6 + $0xb0] sm:$0xff]  ;;  %v1159_v11 = vpack.c.bf16 %v662_v9, %v661_v8 }
 0x2f5   :  { %v1201_v13 = vpack.c.bf16 %v770_v12, %v769_v10  ;;  %v665_v20 = vld [vmem:[%s1668_s5 + $0xd0] sm:$0xff] }
 0x2f6   :  { %942 = vmatprep.mubr.msk.f32.mxu1 %vm234_vm4, %v480_v21  ;;  %1160 = vmatpush1.bf16.msra.mxu0 %v1159_v11  ;;  %v666_v21 = vld [vmem:[%s1668_s5 + $0xd8] sm:$0xff] }
 0x2f7   :  { %619 = vmatmul.mubr.f32.vlgmr.msra.gmra.mrb[2].mxu1 %v479_v23  ;;  %1161 = vmatprep.subr.bf16.mxu0 %v1313_v49  ;;  %v1165_v23 = vpack.c.bf16 %v666_v21, %v665_v20 }
 0x2f8   :  { %1169 = vmatpush1.bf16.msra.mxu1 %v1168_v22  ;;  %v773_v22 = vld [vmem:[%s1669_s6 + $0xd0] sm:$0xff] }
 0x2f9   :  { %1170 = vmatprep.subr.bf16.mxu1 %v1313_v49  ;;  %v1207_v25 = vpack.c.bf16 %v774_v24, %v773_v22 }
 0x2fa   :  { %1163 = vmatpush1.bf16.msra.mxu0 %v1162_v17 }
 0x2fb   :  { %1164 = vmatprep.subr.bf16.mxu0 %v1313_v49 }
 0x2fc   :  { %1172 = vmatpush1.bf16.msra.mxu1 %v1171_v26  ;;  %v941_v26 = vld [vmem:[%s1667_s4 + $0x4] sm:$0x3] }
 0x2fd   :  { %1173 = vmatprep.subr.bf16.mxu1 %v1313_v49  ;;  %v544_v27 = vrot.slane %v941_v26, %v1412_v3  ;;  %v548_v28 = vrot.slane %v941_v26, %v1417_v5  ;;  %v945_v5 = vld [vmem:[%s1670_s7] ss:$0 sm:$0xff] }
 0x2fe   :  { %1166 = vmatpush1.bf16.msra.mxu0 %v1165_v23 }
 0x300   :  { %1175 = vmatpush1.bf16.msra.mxu1 %v1174_v29 }
 0x301   :  { %1176 = vmatprep.subr.bf16.mxu1 %v1313_v49 }
 0x304   :  { %1178 = vmatpush1.bf16.msra.mxu1 %v1177_v32 }
 0x305   :  { %1179 = vmatprep.subr.bf16.mxu1 %v1313_v49 }
 0x308   :  { %1181 = vmatpush1.bf16.msra.mxu1 %v1180_v35 }
 0x309   :  { %1182 = vmatprep.subr.bf16.mxu1 %v1313_v49 }
 0x30c   :  { %1184 = vmatpush1.bf16.msra.mxu1 %v1183_v38 }
 0x30d   :  { %1185 = vmatprep.subr.bf16.mxu1 %v1313_v49 }
 0x310   :  { %1187 = vmatpush1.bf16.msra.mxu1 %v1186_v44  ;;  %v949_v44 = vld [vmem:[%s1672_s9] ss:$0 sm:$0xff]  ;;  %s1314_s9 = smov [#allocation5]  }
 0x311   :  { %1188 = vmatprep.subr.bf16.mxu1 %v1313_v49  ;;  %s917_s10 = sshll.u32 %s1314_s9, 4  ;;  %s918_s10 = int_to_ptr.vmem [resolvable:$true] %s917_s10 }
 0x312   :  { %s1282_s26 = scalar_lea.vmem %s918_s10, 256  ;;  %p1287_p9 = scmp.lt.s32.totalorder %s918_s10, %s918_s10 }
 0x313   :  { %p1283_p8 = scmp.ne.s32.totalorder %s918_s10, %s1282_s26  ;;  %p1288_p10 = scmp.lt.s32.totalorder %s1282_s26, %s1282_s26 }
 0x314   :  { %1190 = vmatpush1.bf16.msra.mxu1 %v1189_v51 }
 0x315   :  { %1191 = vmatprep.subr.bf16.mxu1 %v1313_v49  ;;  %p1289_p11 = por %p1288_p10, %p1287_p9 }
 0x317   :  { %p1290_p12 = pnand %p1289_p11, %p1283_p8 }
 0x318   :  { %1193 = vmatpush1.bf16.msra.mxu1 %v1192_v57 }
 0x319   :  { %1194 = vmatprep.subr.bf16.mxu1 %v1313_v49 }
 0x31c   :  { %1196 = vmatpush1.bf16.msra.mxu1 %v1195_v63 }
 0x31d   :  { %1197 = vmatprep.subr.bf16.mxu1 %v1313_v49 }
 0x320   :  { %1199 = vmatpush1.bf16.msra.mxu1 %v1198_v7 }
 0x321   :  { %1200 = vmatprep.subr.bf16.mxu1 %v1313_v49 }
 0x324   :  { %1202 = vmatpush1.bf16.msra.mxu1 %v1201_v13 }
 0x325   :  { %1203 = vmatprep.subr.bf16.mxu1 %v1313_v49 }
 0x328   :  { %1205 = vmatpush1.bf16.msra.mxu1 %v1204_v19 }
 0x329   :  { %1206 = vmatprep.subr.bf16.mxu1 %v1313_v49 }
 0x32c   :  { %1208 = vmatpush1.bf16.msra.mxu1 %v1207_v25 }
 0x3ca   :  { %v620_v29 = vpop.f32.mrb[2].mxu1 }
 0x3cb   :  { %v621_v30 = vadd.f32 %v620_v29, %v544_v27  ;;  %v622_v31 = vpop.f32.mrb[3].mxu1 }
 0x3cc   :  { %v623_v49 = vadd.f32 %v622_v31, %v548_v28 }
 0x3cd   :  { %v943_v32 = vmul.f32 -1.442695, %v621_v30 }
 0x3ce   :  { %v944_v33 = vmul.f32 -1.442695, %v623_v49 }
 0x3cf   :  { %1242 = vpow2.f32 %v943_v32 }
 0x3d0   :  { %1244 = vpow2.f32 %v944_v33 }
 0x3d9   :  { %v1243_v34 = vpop.eup %1242 }
 0x3da   :  { %v1245_v35 = vpop.eup %1244  ;;  %v631_v36 = vadd.f32 1.0, %v1243_v34 }
 0x3db   :  { %v632_v37 = vadd.f32 1.0, %v1245_v35 }
 0x3dc   :  { %1246 = vrcp.f32 %v631_v36 }
 0x3dd   :  { %1248 = vrcp.f32 %v632_v37 }
 0x3e6   :  { %v1247_v38 = vpop.eup %1246 }
 0x3e7   :  { %v1249_v39 = vpop.eup %1248  ;;  %v637_v3 = vmul.f32 %v1247_v38, %v621_v30 }
 0x3e8   :  { %v638_v40 = vmul.f32 %v1249_v39, %v623_v49 }
 0x3ea   :  { %946 = vmatprep.mubr.msk.f32.mxu0 %vm234_vm4, %v638_v40  ;;  %948 = vmatprep.mubr.msk.f32.mxu1 %vm234_vm4, %v638_v40 }
 0x3eb   :  { %742 = vmatmul.mubr.f32.vlgmr.msra.gmra.mrb[4].mxu0 %v637_v3  ;;  %847 = vmatmul.mubr.f32.vlgmr.msra.gmra.mrb[4].mxu1 %v637_v3 }
 0x4be   :  { %v743_v42 = vpop.f32.mrb[4].mxu0  ;;  %v848_v43 = vpop.f32.mrb[4].mxu1 }
 0x4bf   :  { %v744_v45 = vadd.f32 %v945_v5, %v743_v42  ;;  %v849_v46 = vadd.f32 %v947_v41, %v848_v43  ;;  %v745_v47 = vpop.f32.mrb[5].mxu0  ;;  %v850_v48 = vpop.f32.mrb[5].mxu1 }
 0x4c1   :  { %909 = vst.msk [vmem:[#allocation5] sm:$0xff] %vm908_vm5, %v744_v45  ;;  %v860_v50 = vsub.f32 %v949_v44, %v849_v46 }
 0x4c3   :  { %v864_v51 = vand.u32 2147483647, %v860_v50  ;;  %v861_v62 = vmax.f32 %v860_v50, 0.0  ;;  %vm862_vm7 = vcmp.ne.f32.partialorder %v860_v50, %v860_v50 }
 0x4c5   :  { %v865_v52 = vsub.f32 0.0, %v864_v51 }
 0x4c7   :  { %v866_v53 = vmul.f32 1.442695, %v865_v52 }
 0x4c9   :  { %1250 = vpow2.f32 %v866_v53 }
 0x4d3   :  { %v1251_v54 = vpop.eup %1250 }
 0x4d4   :  { %v868_v55 = vadd.f32 1.0, %v1251_v54  ;;  %v871_v56 = vmul.f32 -0.5, %v1251_v54  ;;  %v874_v58 = vand.u32 2147483647, %v1251_v54 }
 0x4d6   :  { %1252 = vlog2.f32 %v868_v55  ;;  %v872_v57 = vadd.f32 1.0, %v871_v56  ;;  %vm875_vm6 = vcmp.lt.f32.partialorder %v874_v58, 0.0004427343 }
 0x4d8   :  { %v873_v61 = vmul.f32 %v1251_v54, %v872_v57 }
 0x4e0   :  { %v1253_v59 = vpop.eup %1252 }
 0x4e1   :  { %v870_v60 = vmul.f32 0.6931472, %v1253_v59 }
 0x4e3   :  { %v876_v63 = vsel %vm875_vm6, %v873_v61, %v870_v60 }
 0x4e4   :  { %v877_v0 = vadd.f32 %v876_v63, %v861_v62 }
 0x4e6   :  { %v878_v2 = vsel %vm862_vm7, %v860_v50, %v877_v0 }
 0x4e7   :  { %v879_v4 = vsub.f32 %v949_v44, %v878_v2 }
 0x4e9   :  { %v886_v6 = vsub.f32 %v879_v4, %v950_v1 }
 0x4eb   :  { %v890_v7 = vand.u32 2147483647, %v886_v6  ;;  %v887_v18 = vmax.f32 %v886_v6, 0.0  ;;  %vm888_vm9 = vcmp.ne.f32.partialorder %v886_v6, %v886_v6 }
 0x4ed   :  { %v891_v8 = vsub.f32 0.0, %v890_v7 }
 0x4ef   :  { %v892_v9 = vmul.f32 1.442695, %v891_v8 }
 0x4f1   :  { %1254 = vpow2.f32 %v892_v9 }
 0x4fb   :  { %v1255_v10 = vpop.eup %1254 }
 0x4fc   :  { %v894_v11 = vadd.f32 1.0, %v1255_v10  ;;  %v897_v12 = vmul.f32 -0.5, %v1255_v10  ;;  %v900_v14 = vand.u32 2147483647, %v1255_v10 }
 0x4fe   :  { %1256 = vlog2.f32 %v894_v11  ;;  %v898_v13 = vadd.f32 1.0, %v897_v12  ;;  %vm901_vm8 = vcmp.lt.f32.partialorder %v900_v14, 0.0004427343 }
 0x500   :  { %v899_v17 = vmul.f32 %v1255_v10, %v898_v13 }
 0x508   :  { %v1257_v15 = vpop.eup %1256 }
 0x509   :  { %v896_v16 = vmul.f32 0.6931472, %v1257_v15 }
 0x50b   :  { %v902_v19 = vsel %vm901_vm8, %v899_v17, %v896_v16 }
 0x50c   :  { %v903_v20 = vadd.f32 %v902_v19, %v887_v18 }
 0x50e   :  { %v904_v21 = vsel %vm888_vm9, %v886_v6, %v903_v20 }
 0x50f   :  { %v905_v22 = vadd.f32 %v950_v1, %v904_v21 }
 0x511   :  { %v906_v23 = vmul.f32 1.442695, %v905_v22 }
 0x513   :  { %1258 = vpow2.f32 %v906_v23 }
 0x51d   :  { %v1259_v24 = vpop.eup %1258 }
 0x51e   :  { %911 = vst.msk [vmem:[#allocation5 + $0x8] sm:$0xff] %vm908_vm5, %v1259_v24 }
 0x51f   :  { %1293 = shalt.err (!%p1290_p12)
}
 0x520   :  { %s1294_s29 = scalar_lea.hbm %s1674_s11, 256 }
 0x521   :  { %p1295_p13 = scmp.ne.s32.totalorder %s1674_s11, %s1294_s29  ;;  %p1298_p0 = scmp.lt.u32.totalorder %s1294_s29, %s1674_s11 }
 0x523   :  { %p1300_p1 = pnand %p1298_p0, %p1295_p13 }
 0x525   :  { %1303 = shalt.err (!%p1300_p1)
}
 0x526   :  { %s1315_s15 = smov 128   ;;  %s1316_s16 = smov 8  }
 0x527   :  { %923 = dma.vmem_to_hbm [thread:$0]  %s918_s10, 256, %s1674_s11, [#allocation4], %s1315_s15, %s1315_s15, %s1316_s16  }
 0x528   :  { %1306 = dma.done.wait [#allocation4], 256  }
 0x529   :  { %1307 = vsyncadd [#allocation4], 4294967040 }
 0x52a   :  { %927 = vsyncpa [#allocation3], 1 }
 0x52b   :  { %928 = vsyncpa [#allocation4], 1 }

</bundles_post_ra>
